<compile_context>
chip_gen: v7x
topology: tpu7x:2x2x1
jax: 0.10.0
libtpu: 0.0.40
codegen_flags: <defaults>
</compile_context>

<pallas_src>
import jax
import jax.numpy as jnp
from jax import lax
from jax.experimental import pallas as pl
from jax.experimental.pallas import tpu as pltpu

EPS = 1e-5


def _convT_kernel(x_ref, xnext_ref, w_ref, b_ref, y_ref, stat_ref):
    """Fused ConvTranspose2d(k=3,s=2,p=1,op=1) + bias + BN partial statistics.

    x_ref    : (1, TH, W, Cin)    bf16  -- current H tile of the input
    xnext_ref: (1, 1,  W, Cin)    bf16  -- first row of the NEXT tile (clamped; masked
                                           to zero on the last tile == bottom padding)
    w_ref    : (4*Cin, 4*Cout)    bf16  -- pre-packed block RHS, LHS groups
                                           [x00|x01|x10|x11], outputs [ee|eo|oe|oo]
    y_ref    : (1, TH, W, 4*Cout) bf16  -- packed parity output slab (f32 accumulated)
    stat_ref : (1, 1, 2, 4*Cout)  f32   -- per-block [sum; sum_of_squares] over rows
    """
    TH, W, Cin = x_ref.shape[1], x_ref.shape[2], x_ref.shape[3]
    C4 = y_ref.shape[3]

    x = x_ref[0]                                     # (TH, W, Cin)
    nxt = xnext_ref[0]                               # (1,  W, Cin)
    is_last = pl.program_id(1) == pl.num_programs(1) - 1
    nxt = jnp.where(is_last, jnp.zeros_like(nxt), nxt)   # bottom zero-row padding

    # shifted taps (right/bottom zero padding handled here, no wrapper jnp.pad)
    x_down = jnp.concatenate([x[1:], nxt], axis=0)                     # x[m+1, n]
    zcol = jnp.zeros((TH, 1, Cin), x.dtype)
    x_right = jnp.concatenate([x[:, 1:, :], zcol], axis=1)             # x[m,   n+1]
    xd_right = jnp.concatenate([x_down[:, 1:, :], zcol], axis=1)       # x[m+1, n+1]

    # LHS group order must match the packed RHS: [x00 | x01 | x10 | x11]
    xcat = jnp.concatenate([x, x_right, x_down, xd_right], axis=-1)
    xcat = xcat.reshape(TH * W, 4 * Cin)

    # single MXU matmul: bf16 inputs, f32 accumulation
    y = jnp.dot(xcat, w_ref[...], preferred_element_type=jnp.float32)  # (TH*W, 4*Cout)
    y = y + b_ref[...]

    # bf16 store of the intermediate slab (BN re-normalizes; stats stay f32 below)
    y_ref[0] = y.reshape(TH, W, C4).astype(y_ref.dtype)

    # fused BatchNorm partial statistics (reduced across the grid in the wrapper)
    s1 = jnp.sum(y, axis=0, keepdims=True)           # (1, 4*Cout)
    s2 = jnp.sum(y * y, axis=0, keepdims=True)       # (1, 4*Cout)
    stat_ref[0, 0] = jnp.concatenate([s1, s2], axis=0)


def _bn_relu_kernel(y_ref, scale_ref, shift_ref, o_ref):
    """Tiled affine BatchNorm (precomputed scale/shift, f32 math) + ReLU, bf16 in/out."""
    y = y_ref[...].astype(jnp.float32)
    o = jnp.maximum(y * scale_ref[...] + shift_ref[...], 0.0)
    o_ref[...] = o.astype(o_ref.dtype)


def _vmem_budget_bytes():
    """Per-generation VMEM limit: ~70% of physical capacity, capped; safe fallback."""
    try:
        phys = int(pltpu.get_tpu_info().vmem_capacity_bytes)
    except Exception:
        phys = 64 * 1024 * 1024                       # conservative (v7x physical)
    limit = max(32 * 1024 * 1024, min(int(phys * 0.7), 100 * 1024 * 1024))
    return limit


def _pick_tile_h(N, H, W, Cin, Cout, budget):
    """Largest H-divisor whose double-buffered working set fits `budget`; keep the
    (N, n_th) parallel grid >= 2-way when possible (dual-TensorCore balance)."""
    c4 = 4 * Cout
    fixed = 2 * (4 * Cin * c4 * 2 + c4 * 4)           # packed weight + bias (x2 bufs)

    def fits(th):
        x_t = (th * W * Cin + W * Cin) * 2            # bf16 input tile + halo row
        y_t = th * W * c4 * 2 + 2 * c4 * 4            # bf16 packed out + f32 stats
        return fixed + 2 * x_t + 2 * y_t <= budget

    divs = sorted((d for d in range(1, H + 1) if H % d == 0), reverse=True)
    for need_split in (True, False):
        for th in divs:
            if need_split and H > 1 and N * (H // th) < 2:
                continue
            if fits(th):
                return th
    return 1


def upsample3x3_pallas(x_nchw, w, b, gamma, beta, *, tile_h=None):
    """x_nchw: (N, Cin, H, W);  w: (Cin, Cout, 3, 3) PyTorch ConvTranspose2d weight."""
    N, Cin, H, W = x_nchw.shape
    Cout = w.shape[1]
    C4 = 4 * Cout

    vmem_limit = _vmem_budget_bytes()
    if tile_h is None:
        tile_h = _pick_tile_h(N, H, W, Cin, Cout, int(vmem_limit * 0.6))
    assert H % tile_h == 0, (H, tile_h)
    n_th = H // tile_h

    # NHWC, bf16 feed for the MXU (accumulation stays f32 inside the kernel).
    x = jnp.transpose(x_nchw, (0, 2, 3, 1)).astype(jnp.bfloat16)

    # Pre-packed block RHS (4*Cin, 4*Cout): output parity order [ee|eo|oe|oo].
    #   ee = x00@W11
    #   eo = x01@W10 + x00@W12
    #   oe = x10@W01 + x00@W21
    #   oo = x11@W00 + x10@W02 + x01@W20 + x00@W22
    wt = w.astype(jnp.float32)

    def tap(kh, kw):
        return wt[:, :, kh, kw]                      # (Cin, Cout)

    Z = jnp.zeros((Cin, Cout), jnp.float32)
    wb = jnp.concatenate([
        jnp.concatenate([tap(1, 1), tap(1, 2), tap(2, 1), tap(2, 2)], axis=1),  # x00
        jnp.concatenate([Z,         tap(1, 0), Z,         tap(2, 0)], axis=1),  # x01
        jnp.concatenate([Z,         Z,         tap(0, 1), tap(0, 2)], axis=1),  # x10
        jnp.concatenate([Z,         Z,         Z,         tap(0, 0)], axis=1),  # x11
    ], axis=0).astype(jnp.bfloat16)                  # (4*Cin, 4*Cout)
    bias_p = jnp.tile(b.astype(jnp.float32), 4).reshape(1, C4)

    cparams = pltpu.CompilerParams(
        dimension_semantics=("parallel", "parallel"),   # batch and spatial tiles
        vmem_limit_bytes=int(vmem_limit),
    )

    cost1 = pl.CostEstimate(
        flops=int(2 * N * H * W * (4 * Cin) * C4),
        transcendentals=0,
        bytes_accessed=int(x.size * 2 + N * H * W * C4 * 2
                           + N * n_th * (wb.size * 2 + 2 * C4 * 4)),
    )

    # Pass 1: ConvTranspose (+bias) -> packed parity bf16 slab + BN partial sums.
    y, stats = pl.pallas_call(
        _convT_kernel,
        out_shape=(jax.ShapeDtypeStruct((N, H, W, C4), jnp.bfloat16),
                   jax.ShapeDtypeStruct((N, n_th, 2, C4), jnp.float32)),
        grid=(N, n_th),
        in_specs=[
            pl.BlockSpec((1, tile_h, W, Cin), lambda n, t: (n, t, 0, 0)),
            # first row of the next tile (block size 1 on H => element row index);
            # clamped at the boundary and masked to zero inside the kernel.
            pl.BlockSpec((1, 1, W, Cin),
                         lambda n, t: (n, jnp.minimum((t + 1) * tile_h, H - 1), 0, 0)),
            pl.BlockSpec((4 * Cin, C4), lambda n, t: (0, 0)),
            pl.BlockSpec((1, C4), lambda n, t: (0, 0)),
        ],
        out_specs=(
            pl.BlockSpec((1, tile_h, W, C4), lambda n, t: (n, t, 0, 0)),
            pl.BlockSpec((1, 1, 2, C4), lambda n, t: (n, t, 0, 0)),
        ),
        compiler_params=cparams,
        cost_estimate=cost1,
    )(x, x, wb, bias_p)

    # BatchNorm batch statistics from the fused partial sums (tiny XLA reduction).
    s = jnp.sum(stats, axis=(0, 1))                   # (2, 4*Cout)
    s = s.reshape(2, 4, Cout).sum(axis=1)             # fold parity groups -> (2, Cout)
    cnt = jnp.float32(N * H * W * 4)                  # == N * 2H * 2W
    mean = s[0] / cnt
    var = jnp.maximum(s[1] / cnt - mean * mean, 0.0)  # biased variance (training mode)
    inv = gamma.astype(jnp.float32) * lax.rsqrt(var + EPS)
    scale_p = jnp.tile(inv, 4).reshape(1, 1, 1, C4)
    shift_p = jnp.tile(beta.astype(jnp.float32) - mean * inv, 4).reshape(1, 1, 1, C4)
    # TODO(synk): BatchNorm running_mean/running_var updates (training side effect) are not modeled.

    cost2 = pl.CostEstimate(
        flops=int(3 * N * H * W * C4),
        transcendentals=0,
        bytes_accessed=int(2 * N * H * W * C4 * 2 + N * n_th * 2 * C4 * 4),
    )

    # Pass 2: tiled affine BN + ReLU over the packed bf16 slab (bf16 out).
    out_p = pl.pallas_call(
        _bn_relu_kernel,
        out_shape=jax.ShapeDtypeStruct((N, H, W, C4), jnp.bfloat16),
        grid=(N, n_th),
        in_specs=[
            pl.BlockSpec((1, tile_h, W, C4), lambda n, t: (n, t, 0, 0)),
            pl.BlockSpec((1, 1, 1, C4), lambda n, t: (0, 0, 0, 0)),
            pl.BlockSpec((1, 1, 1, C4), lambda n, t: (0, 0, 0, 0)),
        ],
        out_specs=pl.BlockSpec((1, tile_h, W, C4), lambda n, t: (n, t, 0, 0)),
        compiler_params=cparams,
        cost_estimate=cost2,
    )(y, scale_p, shift_p)

    # Single combined parity de-interleave + NHWC->NCHW transpose + f32 cast
    # (one XLA layout pass, reading the bf16 slab).
    out = out_p.reshape(N, H, W, 2, 2, Cout)                    # (n,h,w,a,b,c)
    out = jnp.transpose(out, (0, 5, 1, 3, 2, 4))                # (n,c,h,a,w,b)
    return out.reshape(N, Cout, 2 * H, 2 * W).astype(jnp.float32)


def _reference(x_nchw, w, b, gamma, beta):
    """Pure-JAX reference of the PyTorch forward (ConvT -> BN(train) -> ReLU)."""
    w_conv = jnp.transpose(jnp.flip(w, axis=(2, 3)), (1, 0, 2, 3))  # (Cout, Cin, 3, 3)
    y = lax.conv_general_dilated(
        x_nchw, w_conv, window_strides=(1, 1),
        padding=((1, 2), (1, 2)), lhs_dilation=(2, 2),
        dimension_numbers=("NCHW", "OIHW", "NCHW"),
        precision=lax.Precision.HIGHEST)
    y = y + b[None, :, None, None]
    mean = jnp.mean(y, axis=(0, 2, 3), keepdims=True)
    var = jnp.mean(jnp.square(y - mean), axis=(0, 2, 3), keepdims=True)
    yn = (y - mean) * lax.rsqrt(var + EPS)
    yn = yn * gamma[None, :, None, None] + beta[None, :, None, None]
    return jnp.maximum(yn, 0.0)


if __name__ == "__main__":
    key = jax.random.PRNGKey(0)
    N, Cin, H, W = 2, 8, 16, 16
    Cout = Cin // 2

    k_x, k_w, k_b, k_g, k_bt = jax.random.split(key, 5)
    x = jax.random.normal(k_x, (N, Cin, H, W), jnp.float32)
    w = 0.1 * jax.random.normal(k_w, (Cin, Cout, 3, 3), jnp.float32)   # ConvTranspose2d weight
    b = 0.1 * jax.random.normal(k_b, (Cout,), jnp.float32)             # ConvTranspose2d bias
    gamma = 1.0 + 0.1 * jax.random.normal(k_g, (Cout,), jnp.float32)   # BN weight
    beta = 0.1 * jax.random.normal(k_bt, (Cout,), jnp.float32)         # BN bias

    out = jax.block_until_ready(upsample3x3_pallas(x, w, b, gamma, beta))
    assert out.shape == (N, Cout, 2 * H, 2 * W), out.shape

    # The kernel feeds the MXU in bf16 (f32 accumulation) and stores the intermediate
    # and normalized slabs in bf16 (a deliberate bandwidth optimisation; BN statistics
    # stay f32).  Tolerances below bound the bf16 rounding of O(1) normalized outputs.
    xq = x.astype(jnp.bfloat16).astype(jnp.float32)
    wq = w.astype(jnp.bfloat16).astype(jnp.float32)
    ref_q = jax.block_until_ready(_reference(xq, wq, b, gamma, beta))
    err_q = float(jnp.max(jnp.abs(out - ref_q)))
    assert jnp.allclose(out, ref_q, atol=4e-2, rtol=4e-2), err_q

    # Loose check against the full-f32 PyTorch-equivalent forward.
    ref = jax.block_until_ready(_reference(x, w, b, gamma, beta))
    err = float(jnp.max(jnp.abs(out - ref)))
    assert jnp.allclose(out, ref, atol=8e-2, rtol=8e-2), err

    print("KERNEL_OK")
</pallas_src>

<mosaic_0001>
module attributes {stable_mosaic.version = 11 : i64} {
  func.func @_convT_kernel(%arg0: i32, %arg1: i32, %arg2: memref<1x16x16x8xbf16, #tpu.memory_space<vmem>>, %arg3: memref<1x1x16x8xbf16, #tpu.memory_space<vmem>>, %arg4: memref<32x16xbf16, #tpu.memory_space<vmem>>, %arg5: memref<1x16xf32, #tpu.memory_space<vmem>>, %arg6: memref<1x16x16x16xbf16, #tpu.memory_space<vmem>>, %arg7: memref<1x1x2x16xf32, #tpu.memory_space<vmem>>) attributes {dimension_semantics = [#tpu.dimension_semantics<parallel>, #tpu.dimension_semantics<parallel>], iteration_bounds = array<i64: 2, 1>, scalar_prefetch = 0 : i64, scratch_operands = 0 : i64, tpu.core_type = #tpu.core_type<tc>, window_params = [{transform_indices = @transform_0, window_bounds = array<i64: 1, 16, 16, 8>}, {transform_indices = @transform_1, window_bounds = array<i64: 1, 1, 16, 8>}, {pipeline_mode = #tpu.pipeline_mode<synchronous>, transform_indices = @transform_2, window_bounds = array<i64: 32, 16>}, {pipeline_mode = #tpu.pipeline_mode<synchronous>, transform_indices = @transform_3, window_bounds = array<i64: 1, 16>}, {transform_indices = @transform_4, window_bounds = array<i64: 1, 16, 16, 16>}, {transform_indices = @transform_5, window_bounds = array<i64: 1, 1, 2, 16>}]} {
    %c0 = arith.constant 0 : index
    %c0_0 = arith.constant 0 : index
    %c0_1 = arith.constant 0 : index
    %c0_2 = arith.constant 0 : index
    %0 = vector.load %arg2[%c0, %c0_0, %c0_1, %c0_2] : memref<1x16x16x8xbf16, #tpu.memory_space<vmem>>, vector<1x16x16x8xbf16>
    %1 = vector.shape_cast %0 : vector<1x16x16x8xbf16> to vector<16x16x8xbf16>
    %c0_3 = arith.constant 0 : index
    %c0_4 = arith.constant 0 : index
    %c0_5 = arith.constant 0 : index
    %c0_6 = arith.constant 0 : index
    %2 = vector.load %arg3[%c0_3, %c0_4, %c0_5, %c0_6] : memref<1x1x16x8xbf16, #tpu.memory_space<vmem>>, vector<1x1x16x8xbf16>
    %3 = vector.shape_cast %2 : vector<1x1x16x8xbf16> to vector<1x16x8xbf16>
    %c0_i32 = arith.constant 0 : i32
    %4 = arith.cmpi eq, %arg1, %c0_i32 : i32
    %cst = arith.constant 0.000000e+00 : bf16
    %5 = vector.broadcast %cst : bf16 to vector<1x16x8xbf16>
    %6 = arith.select %4, %5, %3 : vector<1x16x8xbf16>
    %7 = vector.extract_strided_slice %1 {offsets = [1, 0, 0], sizes = [15, 16, 8], strides = [1, 1, 1]} : vector<16x16x8xbf16> to vector<15x16x8xbf16>
    %8 = tpu.concatenate %7, %6 in 0 : vector<15x16x8xbf16>, vector<1x16x8xbf16> -> vector<16x16x8xbf16>
    %cst_7 = arith.constant 0.000000e+00 : bf16
    %9 = vector.broadcast %cst_7 : bf16 to vector<16x1x8xbf16>
    %10 = vector.extract_strided_slice %1 {offsets = [0, 1, 0], sizes = [16, 15, 8], strides = [1, 1, 1]} : vector<16x16x8xbf16> to vector<16x15x8xbf16>
    %11 = tpu.concatenate %10, %9 in 1 : vector<16x15x8xbf16>, vector<16x1x8xbf16> -> vector<16x16x8xbf16>
    %12 = vector.extract_strided_slice %8 {offsets = [0, 1, 0], sizes = [16, 15, 8], strides = [1, 1, 1]} : vector<16x16x8xbf16> to vector<16x15x8xbf16>
    %13 = tpu.concatenate %12, %9 in 1 : vector<16x15x8xbf16>, vector<16x1x8xbf16> -> vector<16x16x8xbf16>
    %14 = tpu.concatenate %1, %11, %8, %13 in 2 : vector<16x16x8xbf16>, vector<16x16x8xbf16>, vector<16x16x8xbf16>, vector<16x16x8xbf16> -> vector<16x16x32xbf16>
    %15 = vector.shape_cast %14 : vector<16x16x32xbf16> to vector<256x32xbf16>
    %c0_8 = arith.constant 0 : index
    %c0_9 = arith.constant 0 : index
    %16 = vector.load %arg4[%c0_8, %c0_9] : memref<32x16xbf16, #tpu.memory_space<vmem>>, vector<32x16xbf16>
    %cst_10 = arith.constant dense<0.000000e+00> : vector<256x16xf32>
    %17 = tpu.matmul %15, %16, %cst_10 {dimension_numbers = #tpu.dot_dimension_numbers<[1], [0], [0], [1], [0, 0, 1, 1], [], []>} : vector<256x32xbf16>, vector<32x16xbf16>, vector<256x16xf32> -> vector<256x16xf32>
    %c0_11 = arith.constant 0 : index
    %c0_12 = arith.constant 0 : index
    %18 = vector.load %arg5[%c0_11, %c0_12] : memref<1x16xf32, #tpu.memory_space<vmem>>, vector<1x16xf32>
    %19 = vector.broadcast %18 : vector<1x16xf32> to vector<256x16xf32>
    %20 = arith.addf %17, %19 : vector<256x16xf32>
    %21 = vector.shape_cast %20 : vector<256x16xf32> to vector<16x16x16xf32>
    %22 = arith.truncf %21 : vector<16x16x16xf32> to vector<16x16x16xbf16>
    %c0_13 = arith.constant 0 : index
    %c0_14 = arith.constant 0 : index
    %c0_15 = arith.constant 0 : index
    %c0_16 = arith.constant 0 : index
    %23 = vector.load %arg6[%c0_13, %c0_14, %c0_15, %c0_16] : memref<1x16x16x16xbf16, #tpu.memory_space<vmem>>, vector<1x16x16x16xbf16>
    %24 = vector.shape_cast %23 : vector<1x16x16x16xbf16> to vector<16x16x16xbf16>
    %25 = vector.shape_cast %22 : vector<16x16x16xbf16> to vector<1x16x16x16xbf16>
    tpu.vector_store %arg6[%c0_13, %c0_14, %c0_15, %c0_16], %25 {strides = array<i32>} : memref<1x16x16x16xbf16, #tpu.memory_space<vmem>>, vector<1x16x16x16xbf16>,
    %cst_17 = arith.constant dense<0.000000e+00> : vector<16xf32>
    %26 = vector.multi_reduction <add>, %20, %cst_17 [0] : vector<256x16xf32> to vector<16xf32>
    %27 = vector.shape_cast %26 : vector<16xf32> to vector<1x16xf32>
    %28 = arith.mulf %20, %20 : vector<256x16xf32>
    %cst_18 = arith.constant dense<0.000000e+00> : vector<16xf32>
    %29 = vector.multi_reduction <add>, %28, %cst_18 [0] : vector<256x16xf32> to vector<16xf32>
    %30 = vector.shape_cast %29 : vector<16xf32> to vector<1x16xf32>
    %31 = tpu.concatenate %27, %30 in 0 : vector<1x16xf32>, vector<1x16xf32> -> vector<2x16xf32>
    %c0_19 = arith.constant 0 : index
    %c0_20 = arith.constant 0 : index
    %c0_21 = arith.constant 0 : index
    %c0_22 = arith.constant 0 : index
    %32 = vector.load %arg7[%c0_19, %c0_20, %c0_21, %c0_22] : memref<1x1x2x16xf32, #tpu.memory_space<vmem>>, vector<1x1x2x16xf32>
    %33 = vector.shape_cast %32 : vector<1x1x2x16xf32> to vector<2x16xf32>
    %34 = vector.shape_cast %31 : vector<2x16xf32> to vector<1x1x2x16xf32>
    tpu.vector_store %arg7[%c0_19, %c0_20, %c0_21, %c0_22], %34 {strides = array<i32>} : memref<1x1x2x16xf32, #tpu.memory_space<vmem>>, vector<1x1x2x16xf32>,
    return
  }
  func.func @transform_0(%arg0: i32, %arg1: i32) -> (i32, i32, i32, i32) {
    %c0_i32 = arith.constant 0 : i32
    %c0_i32_0 = arith.constant 0 : i32
    %c0_i32_1 = arith.constant 0 : i32
    return %arg0, %arg1, %c0_i32, %c0_i32_0 : i32, i32, i32, i32
  }
  func.func @transform_1(%arg0: i32, %arg1: i32) -> (i32, i32, i32, i32) {
    %c1_i32 = arith.constant 1 : i32
    %0 = arith.addi %arg1, %c1_i32 : i32
    %c16_i32 = arith.constant 16 : i32
    %1 = arith.muli %0, %c16_i32 : i32
    %c15_i32 = arith.constant 15 : i32
    %2 = arith.minsi %1, %c15_i32 : i32
    %c0_i32 = arith.constant 0 : i32
    %c0_i32_0 = arith.constant 0 : i32
    %c0_i32_1 = arith.constant 0 : i32
    return %arg0, %2, %c0_i32, %c0_i32_0 : i32, i32, i32, i32
  }
  func.func @transform_2(%arg0: i32, %arg1: i32) -> (i32, i32) {
    %c0_i32 = arith.constant 0 : i32
    %c0_i32_0 = arith.constant 0 : i32
    %c0_i32_1 = arith.constant 0 : i32
    return %c0_i32, %c0_i32_0 : i32, i32
  }
  func.func @transform_3(%arg0: i32, %arg1: i32) -> (i32, i32) {
    %c0_i32 = arith.constant 0 : i32
    %c0_i32_0 = arith.constant 0 : i32
    %c0_i32_1 = arith.constant 0 : i32
    return %c0_i32, %c0_i32_0 : i32, i32
  }
  func.func @transform_4(%arg0: i32, %arg1: i32) -> (i32, i32, i32, i32) {
    %c0_i32 = arith.constant 0 : i32
    %c0_i32_0 = arith.constant 0 : i32
    %c0_i32_1 = arith.constant 0 : i32
    return %arg0, %arg1, %c0_i32, %c0_i32_0 : i32, i32, i32, i32
  }
  func.func @transform_5(%arg0: i32, %arg1: i32) -> (i32, i32, i32, i32) {
    %c0_i32 = arith.constant 0 : i32
    %c0_i32_0 = arith.constant 0 : i32
    %c0_i32_1 = arith.constant 0 : i32
    return %arg0, %arg1, %c0_i32, %c0_i32_0 : i32, i32, i32, i32
  }
}

</mosaic_0001>

<bundles_post_ra>
// kernel: tpu_custom_call.1
= control target key start
LH: loop header
LB: loop body
LE: loop exit
PB: predicated region body
PF: predicated region fallthrough
CT: control target
= control target key end

     0   :  { %11 = vsyncpa [#allocation3], 0  ;;  %s2552_s0 = inlined_call_operand.vmem [shape: bf16[2,16,16,8], index: 0, kind: input, shape index: {}]   ;;  %s2553_s1 = inlined_call_operand.vmem [shape: bf16[2,16,16,8], index: 1, kind: input, shape index: {}]   ;;  %s2554_s2 = inlined_call_operand.vmem [shape: bf16[32,16], index: 2, kind: input, shape index: {}]   ;;  %s2555_s3 = inlined_call_operand.vmem [shape: f32[1,16], index: 3, kind: input, shape index: {}]   ;;  %s2556_s4 = inlined_call_operand.hbm [shape: bf16[2,16,16,16], index: 4, kind: output, shape index: {0}]   ;;  %s2557_s5 = inlined_call_operand.hbm [shape: f32[2,1,2,16], index: 5, kind: output, shape index: {1}]  }
   0x1   :  { %13 = vsyncpa [#allocation3 + $0x1], 0 }
   0x2   :  { %14 = vsyncpa [#allocation5], 0 }
   0x3   :  { %16 = vsyncpa [#allocation5 + $0x1], 0  ;;  %s1964_s18 = smov 0   ;;  %s1966_s19 = smov 0  }
   0x4   :  { %s1968_s1 = smov 0   ;;  %s1970_s20 = smov 0  }
   0x5   :  { %s1972_s21 = smov 0   ;;  %s1974_s22 = smov 0  }
   0x6 LB: > { %s1550_s23 = sadd.s32 4294967295, %s1924_s22   ;;  %s1551_s24 = sadd.s32 4294967294, %s1924_s22   ;;  %s1924_s22 = sphi %s1974_s22, %s22_s22   ;;  %s1920_s21 = sphi %s1972_s21, %s2566_s21   ;;  %s1916_s20 = sphi %s1970_s20, %s2565_s20   ;;  %s1912_s1 = sphi %s1968_s1, %s2564_s1   ;;  %s1908_s19 = sphi %s1966_s19, %s2563_s19   ;;  %s1904_s18 = sphi %s1964_s18, %s2562_s18  }
   0x7   : > { %s34_s25 = sadd.s32 1, %s1920_s21  ;;  %s149_s26 = sadd.s32 1, %s1912_s1 }
   0x8   : > { %p36_p0 = scmp.ge.s32.totalorder %s34_s25, 2  ;;  %p159_p1 = scmp.ne.s32.totalorder %s1912_s1, %s1908_s19 }
   0x9   : > { %p160_p2 = scmp.eq.s32.totalorder %s1550_s23, 1  ;;  %p165_p3 = scmp.ne.s32.totalorder %s1908_s19, %s1904_s18 }
   0xa   : > { %s2568_s25 = smov (%p36_p0, %s34_s25), 0  ;;  %p166_p5 = scmp.eq.s32.totalorder %s1551_s24, 1 }
   0xb   : > { %p2004_p4 = por %p160_p2, %p159_p1  ;;  %s144_s28 = ssub.s32 %s1920_s21, %s2568_s25 }
   0xc   : > { %p1554_p6 = scmp.ge.s32.totalorder %s1924_s22, 1  ;;  %p147_p7 = scmp.eq.s32.totalorder %s144_s28, 0 }
   0xd   : > { %p2011_p8 = por %p166_p5, %p165_p3  ;;  %p252_p9 = scmp.lt.s32.totalorder %s1924_s22, 3 }
   0xe   : > { %s2017_s30 = scalar_select %p147_p7, %s1912_s1, %s149_s26  }
   0xf   : > { %p253_p10 = pnand %p1554_p6, %p252_p9 }
  0x10   : > { %p304_p11 = scmp.lt.s32.totalorder (!%p253_p10), %s1916_s20, 1  ;;  %vm582_vm0 = vsmask.f32 (!%p253_p10), 7424  ;;  %v1812_v0 = vld [vmem:[%s2554_s2] sm:$0xff] (!%p253_p10)   ;;  %vm581_vm1 = vcmask (!%p253_p10), 1047552   ;;  %s1926_s13 = smov (!%p253_p10), 16  }
  0x11   : > { %256 = sbr.rel (%p253_p10) target bundleno = 508 (0x1fc), region = 36  ;;  %1690 = vmatprep.subr.bf16.mxu0 (!%p253_p10), %v1812_v0  ;;  %1726 = vmatprep.subr.bf16.mxu1 (!%p253_p10), %v1812_v0  ;;  %vm2064_vm2 = vmand (!%p253_p10), %vm581_vm1, %vm582_vm0  ;;  %s1927_s14 = smov (!%p253_p10), 8   ;;  %v1813_v44 = vld [vmem:[%s2554_s2 + $0x8] sm:$0xff] (!%p253_p10)   ;;  %vm727_vm3 = vcmask (!%p253_p10), 64512   ;;  %vm760_vm4 = vcmask (!%p253_p10), 130048   ;;  %vm793_vm5 = vcmask (!%p253_p10), 195584  }
  0x12   : > { %1691 = vmatpush3.bf16.msra.mxu0 (!%p253_p10), %v1812_v0  ;;  %1728 = vmatpush3.bf16.msra.mxu1 (!%p253_p10), %v1812_v0  ;;  %s1928_s15 = smov (!%p253_p10), 24   ;;  %vm849_vm6 = vcmask (!%p253_p10), 261120   ;;  %s2296_s23 = sand.u32 (!%p253_p10), 1, %s1908_s19   ;;  %vm1171_vm7 = vcmask (!%p253_p10), 125952  }
  0x13   : > { %1692 = vmatprep.subr.bf16.mxu0 (!%p253_p10), %v1813_v44  ;;  %1727 = vmatprep.subr.bf16.mxu1 (!%p253_p10), %v1813_v44  ;;  %s1555_s28 = sshll.u32 (!%p253_p10), %s2296_s23, 7  ;;  %s1379_s12 = scalar_lea.sflag (!%p253_p10), [#allocation3], %s2296_s23 }
  0x16   : > { %1693 = vmatpush3.bf16.msra.mxu0 (!%p253_p10), %v1813_v44  ;;  %1729 = vmatpush3.bf16.msra.mxu1 (!%p253_p10), %v1813_v44 }
  0x18   : > { %s305_s6 = scalar_select %p304_p11, %s1916_s20, 1 }
  0x1a   : > { %s1636_s7 = sshll.u32 %s305_s6, 7  ;;  %s2308_s6 = scalar_lea.vmem [#allocation2], %s1555_s28 }
  0x1b   : > { %s2024_s10 = scalar_lea.vmem %s2552_s0, %s1636_s7  ;;  %s1671_s7 = sshll.u32 %s1916_s20, 11 }
  0x1c   : > { %v2030_v1 = vld [vmem:[%s2024_s10 + $0x8] sm:$0xff]   ;;  %v2033_v2 = vld [vmem:[%s2024_s10 + $0x18] sm:$0xff]   ;;  %v2038_v3 = vld [vmem:[%s2024_s10 + $0x10] sm:$0xff]   ;;  %s1400_s8 = sshll.u32 %s2308_s6, 4  ;;  %s2458_s11 = scalar_lea.hbm %s2556_s4, %s1671_s7  ;;  %s2460_s8 = int_to_ptr.vmem [resolvable:$true] %s1400_s8 }
  0x1d   : > { %662 = vrot.lane.b32.xlu1 %v2030_v1, %s1926_s13  ;;  %v461_v4 = vshrl.u32 %v2030_v1, 16  ;;  %666 = vrot.lane.b32.xlu0 %v2033_v2, %s1926_s13  ;;  %v2044_v5 = vld [vmem:[%s2024_s10] sm:$0xff]   ;;  %v463_v6 = vshll.u32 %v2030_v1, 16  ;;  %v468_v8 = vshrl.u32 %v2038_v3, 16  ;;  %v470_v12 = vshll.u32 %v2038_v3, 16  ;;  %v2060_v18 = vld [vmem:[%s2024_s10 + $0x28] sm:$0xff]  }
  0x1e   : > { %v2048_v7 = vld [vmem:[%s2024_s10 + $0x20] sm:$0xff]   ;;  %v454_v9 = vshrl.u32 %v2044_v5, 16  ;;  %v456_v10 = vshll.u32 %v2044_v5, 16  ;;  %v477_v13 = vshll.u32 %v2033_v2, 16  ;;  %v475_v17 = vshrl.u32 %v2033_v2, 16  ;;  %v2084_v35 = vld [vmem:[%s2024_s10 + $0x30] sm:$0xff]  }
  0x1f   : > { %v465_v11 = vrot.slane %v463_v6, 1  ;;  %v484_v14 = vshll.u32 %v2048_v7, 16  ;;  %v472_v16 = vrot.slane %v470_v12, 1  ;;  %v482_v24 = vshrl.u32 %v2048_v7, 16  ;;  %v2092_v39 = vld [vmem:[%s2024_s10 + $0x38] sm:$0xff]   ;;  %v2107_v48 = vld [vmem:[%s2024_s10 + $0x40] sm:$0xff]  }
  0x20   : > { %v458_v15 = vrot.slane %v456_v10, 1  ;;  %v479_v20 = vrot.slane %v477_v13, 1  ;;  %v491_v29 = vshll.u32 %v2060_v18, 16  ;;  %v489_v33 = vshrl.u32 %v2060_v18, 16  ;;  %v2116_v52 = vld [vmem:[%s2024_s10 + $0x48] sm:$0xff]   ;;  %v2129_v60 = vld [vmem:[%s2024_s10 + $0x50] sm:$0xff]  }
  0x21   : > { %664 = vrot.lane.b32.xlu1 %v2038_v3, %s1926_s13  ;;  %v466_v22 = vor.u32 %v465_v11, %v461_v4  ;;  %v473_v23 = vor.u32 %v472_v16, %v468_v8  ;;  %v486_v25 = vrot.slane %v484_v14, 1  ;;  %v498_v38 = vshll.u32 %v2084_v35, 16  ;;  %v2138_v0 = vld [vmem:[%s2024_s10 + $0x58] sm:$0xff]   ;;  %v2151_v13 = vld [vmem:[%s2024_s10 + $0x60] sm:$0xff]  }
  0x22   : > { %v459_v21 = vor.u32 %v458_v15, %v454_v9  ;;  %v480_v28 = vor.u32 %v479_v20, %v475_v17  ;;  %v493_v34 = vrot.slane %v491_v29, 1  ;;  %v496_v41 = vshrl.u32 %v2084_v35, 16  ;;  %v2160_v17 = vld [vmem:[%s2024_s10 + $0x68] sm:$0xff]  }
  0x23   : > { %v586_v27 = vsel %vm2064_vm2, %v473_v23, 0  ;;  %v585_v30 = vsel %vm2064_vm2, %v466_v22, 0  ;;  %v487_v32 = vor.u32 %v486_v25, %v482_v24  ;;  %v500_v42 = vrot.slane %v498_v38, 1 }
  0x24   : > { %v584_v26 = vsel %vm2064_vm2, %v459_v21, 0  ;;  %v587_v31 = vsel %vm2064_vm2, %v480_v28, 0  ;;  %v494_v37 = vor.u32 %v493_v34, %v489_v33  ;;  %v505_v43 = vshll.u32 %v2092_v39, 16 }
  0x25   : > { %668 = vrot.lane.b32.xlu1 %v2048_v7, %s1926_s13  ;;  %630 = vrot.lane.b32.xlu0 %v584_v26, %s1927_s14  ;;  %v588_v36 = vsel %vm2064_vm2, %v487_v32, 0  ;;  %v501_v45 = vor.u32 %v500_v42, %v496_v41  ;;  %v503_v46 = vshrl.u32 %v2092_v39, 16  ;;  %v512_v51 = vshll.u32 %v2107_v48, 16 }
  0x26   : > { %v589_v40 = vsel %vm2064_vm2, %v494_v37, 0  ;;  %v507_v47 = vrot.slane %v505_v43, 1  ;;  %v510_v54 = vshrl.u32 %v2107_v48, 16  ;;  %v519_v56 = vshll.u32 %v2116_v52, 16 }
  0x27   : > { %v590_v49 = vsel %vm2064_vm2, %v501_v45, 0  ;;  %v514_v55 = vrot.slane %v512_v51, 1  ;;  %v517_v58 = vshrl.u32 %v2116_v52, 16  ;;  %v526_v63 = vshll.u32 %v2129_v60, 16 }
  0x28   : > { %v508_v50 = vor.u32 %v507_v47, %v503_v46  ;;  %v521_v59 = vrot.slane %v519_v56, 1  ;;  %v524_v6 = vshrl.u32 %v2129_v60, 16  ;;  %v533_v9 = vshll.u32 %v2138_v0, 16 }
  0x29   : > { %697 = vrot.lane.b32.xlu1 %v586_v27, %s1928_s15  ;;  %632 = vrot.lane.b32.xlu0 %v585_v30, %s1927_s14  ;;  %v515_v57 = vor.u32 %v514_v55, %v510_v54  ;;  %v528_v8 = vrot.slane %v526_v63, 1  ;;  %v531_v11 = vshrl.u32 %v2138_v0, 16  ;;  %v540_v16 = vshll.u32 %v2151_v13, 16 }
  0x2a   : > { %v591_v53 = vsel %vm2064_vm2, %v508_v50, 0  ;;  %v522_v62 = vor.u32 %v521_v59, %v517_v58  ;;  %v535_v12 = vrot.slane %v533_v9, 1  ;;  %v538_v21 = vshrl.u32 %v2151_v13, 16 }
  0x2b   : > { %v592_v61 = vsel %vm2064_vm2, %v515_v57, 0  ;;  %v529_v10 = vor.u32 %v528_v8, %v524_v6  ;;  %v542_v22 = vrot.slane %v540_v16, 1  ;;  %v547_v23 = vshll.u32 %v2160_v17, 16 }
  0x2c   : > { %v593_v4 = vsel %vm2064_vm2, %v522_v62, 0  ;;  %v536_v15 = vor.u32 %v535_v12, %v531_v11  ;;  %v545_v25 = vshrl.u32 %v2160_v17, 16  ;;  %v1929_v41 = vmov 0  }
  0x2d   : > { %636 = vrot.lane.b32.xlu1 %v587_v31, %s1927_s14  ;;  %695 = vrot.lane.b32.xlu0 %v585_v30, %s1928_s15  ;;  %v594_v14 = vsel %vm2064_vm2, %v529_v10, 0  ;;  %v543_v24 = vor.u32 %v542_v22, %v538_v21  ;;  %v549_v26 = vrot.slane %v547_v23, 1  ;;  %v1577_v42 = vcombine.low %v1929_v41, %v1929_v41 }
  0x2e   : > { %v595_v20 = vsel %vm2064_vm2, %v536_v15, 0 }
  0x2f   : > { %v596_v28 = vsel %vm2064_vm2, %v543_v24, 0  ;;  %v550_v29 = vor.u32 %v549_v26, %v545_v25  ;;  %v608_v45 = vshll.u32 %v1577_v42, 16  ;;  %v606_v47 = vshrl.u32 %v1577_v42, 16 }
  0x31   : > { %701 = vrot.lane.b32.xlu1 %v588_v36, %s1928_s15  ;;  %634 = vrot.lane.b32.xlu0 %v586_v27, %s1927_s14  ;;  %v2173_v27 = vld [vmem:[%s2024_s10 + $0x70] sm:$0xff]   ;;  %v597_v32 = vsel %vm2064_vm2, %v550_v29, 0 }
  0x32   : > { %v554_v30 = vshll.u32 %v2173_v27, 16  ;;  %v552_v33 = vshrl.u32 %v2173_v27, 16 }
  0x34   : > { %v556_v34 = vrot.slane %v554_v30, 1 }
  0x35   : > { %640 = vrot.lane.b32.xlu1 %v589_v40, %s1927_s14  ;;  %699 = vrot.lane.b32.xlu0 %v587_v31, %s1928_s15  ;;  %v2182_v31 = vld [vmem:[%s2024_s10 + $0x78] sm:$0xff]  }
  0x36   : > { %v557_v37 = vor.u32 %v556_v34, %v552_v33  ;;  %v559_v38 = vshrl.u32 %v2182_v31, 16 }
  0x38   : > { %v598_v43 = vsel %vm2064_vm2, %v557_v37, 0 }
  0x39   : > { %672 = vrot.lane.b32.xlu1 %v2084_v35, %s1926_s13  ;;  %638 = vrot.lane.b32.xlu0 %v588_v36, %s1927_s14  ;;  %v561_v36 = vshll.u32 %v2182_v31, 16 }
  0x3d   : > { %705 = vrot.lane.b32.xlu1 %v590_v49, %s1928_s15  ;;  %670 = vrot.lane.b32.xlu0 %v2060_v18, %s1926_s13 }
  0x41   : > { %644 = vrot.lane.b32.xlu1 %v591_v53, %s1927_s14  ;;  %703 = vrot.lane.b32.xlu0 %v589_v40, %s1928_s15  ;;  %v563_v40 = vrot.slane %v561_v36, 1 }
  0x43   : > { %v564_v44 = vor.u32 %v563_v40, %v559_v38 }
  0x45   : > { %676 = vrot.lane.b32.xlu1 %v2107_v48, %s1926_s13  ;;  %642 = vrot.lane.b32.xlu0 %v590_v49, %s1927_s14  ;;  %v599_v46 = vsel %vm2064_vm2, %v564_v44, 0  ;;  %v610_v49 = vrot.slane %v608_v45, 1 }
  0x47   : > { %v611_v50 = vor.u32 %v610_v49, %v606_v47 }
  0x49   : > { %709 = vrot.lane.b32.xlu1 %v592_v61, %s1928_s15  ;;  %674 = vrot.lane.b32.xlu0 %v2092_v39, %s1926_s13  ;;  %v613_v51 = vsel %vm2064_vm2, %v611_v50, 0 }
  0x4d   : > { %648 = vrot.lane.b32.xlu1 %v593_v4, %s1927_s14  ;;  %707 = vrot.lane.b32.xlu0 %v591_v53, %s1928_s15 }
  0x51   : > { %680 = vrot.lane.b32.xlu1 %v2129_v60, %s1926_s13  ;;  %646 = vrot.lane.b32.xlu0 %v592_v61, %s1927_s14 }
  0x55   : > { %713 = vrot.lane.b32.xlu1 %v594_v14, %s1928_s15  ;;  %678 = vrot.lane.b32.xlu0 %v2116_v52, %s1926_s13 }
  0x59   : > { %652 = vrot.lane.b32.xlu1 %v595_v20, %s1927_s14  ;;  %711 = vrot.lane.b32.xlu0 %v593_v4, %s1928_s15 }
  0x5d   : > { %684 = vrot.lane.b32.xlu1 %v2151_v13, %s1926_s13  ;;  %650 = vrot.lane.b32.xlu0 %v594_v14, %s1927_s14 }
  0x61   : > { %717 = vrot.lane.b32.xlu1 %v596_v28, %s1928_s15  ;;  %682 = vrot.lane.b32.xlu0 %v2138_v0, %s1926_s13 }
  0x65   : > { %656 = vrot.lane.b32.xlu1 %v597_v32, %s1927_s14  ;;  %715 = vrot.lane.b32.xlu0 %v595_v20, %s1928_s15 }
  0x69   : > { %688 = vrot.lane.b32.xlu1 %v2173_v27, %s1926_s13  ;;  %654 = vrot.lane.b32.xlu0 %v596_v28, %s1927_s14 }
  0x6d   : > { %721 = vrot.lane.b32.xlu1 %v598_v43, %s1928_s15  ;;  %686 = vrot.lane.b32.xlu0 %v2160_v17, %s1926_s13 }
  0x71   : > { %660 = vrot.lane.b32.xlu1 %v599_v46, %s1927_s14  ;;  %719 = vrot.lane.b32.xlu0 %v597_v32, %s1928_s15 }
  0x75   : > { %692 = vrot.lane.b32.xlu1 %v1577_v42, %s1926_s13  ;;  %658 = vrot.lane.b32.xlu0 %v598_v43, %s1927_s14  ;;  %s1930_s14 = smov [#allocation2]  }
  0x79   : > { %725 = vrot.lane.b32.xlu1 %v613_v51, %s1928_s15  ;;  %690 = vrot.lane.b32.xlu0 %v2182_v31, %s1926_s13  ;;  %s1814_s13 = scalar_lea.vmem %s2460_s8, 2048 }
  0x7a   : > { %p1815_p12 = scmp.ne.s32.totalorder %s2460_s8, %s1814_s13 }
  0x7c   : > { %p1816_p13 = pnand %p1815_p12, %p2004_p4 }
  0x7d   : > { %723 = vrot.lane.b32.xlu0 %v599_v46, %s1928_s15  ;;  %s1818_s15 = sshll.u32 %s1930_s14, 4  ;;  %s1819_s15 = int_to_ptr.vmem [resolvable:$false] %s1818_s15 }
  0x7e   : > { %p1817_p0 = pneg %p1816_p13  ;;  %s1820_s16 = scalar_lea.vmem %s1819_s15, 4096 }
  0x7f   : > { %p1821_p1 = scmp.lt.s32.totalorder %s2460_s8, %s1819_s15  ;;  %p1822_p2 = scmp.lt.s32.totalorder %s1820_s16, %s1814_s13 }
  0x81   : > { %p1823_p3 = por %p1822_p2, %p1821_p1 }
  0x83   : > { %p1824_p5 = pnand %p1823_p3, %p1817_p0 }
  0x8f   : > { %v663_v53 = vpop.permute.xlu1 %662  ;;  %v667_v54 = vpop.permute.xlu0 %666 }
  0x93   : > { %v665_v55 = vpop.permute.xlu1 %664 }
  0x97   : > { %v669_v56 = vpop.permute.xlu1 %668  ;;  %v631_v57 = vpop.permute.xlu0 %630 }
  0x98   : > { %v729_v19 = vsel %vm727_vm3, %v2044_v5, %v631_v57 }
  0x99   : > { %v762_v6 = vsel %vm760_vm4, %v729_v19, %v663_v53 }
  0x9b   : > { %v698_v58 = vpop.permute.xlu1 %697  ;;  %v633_v59 = vpop.permute.xlu0 %632 }
  0x9c   : > { %v731_v61 = vsel %vm727_vm3, %v2030_v1, %v633_v59 }
  0x9d   : > { %v764_v63 = vsel %vm760_vm4, %v731_v61, %v665_v55 }
  0x9e   : > { %v797_v9 = vsel %vm793_vm5, %v764_v63, %v698_v58 }
  0x9f   : > { %v637_v62 = vpop.permute.xlu1 %636  ;;  %v696_v4 = vpop.permute.xlu0 %695 }
  0xa0   : > { %v795_v8 = vsel %vm793_vm5, %v762_v6, %v696_v4  ;;  %v735_v11 = vsel %vm727_vm3, %v2033_v2, %v637_v62 }
  0xa1   : > { %1694 = vmatprep.mubr.msk.bf16.mxu0 %vm849_vm6, %v795_v8  ;;  %v768_v16 = vsel %vm760_vm4, %v735_v11, %v669_v56 }
  0xa2   : > { %1695 = vmatmul.mubr.msk.bf16.vlgmr.msra.gmra.mrb[0].mxu0 %vm849_vm6, %v797_v9 }
  0xa3   : > { %v702_v10 = vpop.permute.xlu1 %701  ;;  %v635_v5 = vpop.permute.xlu0 %634 }
  0xa4   : > { %v733_v1 = vsel %vm727_vm3, %v2038_v3, %v635_v5  ;;  %v801_v21 = vsel %vm793_vm5, %v768_v16, %v702_v10 }
  0xa5   : > { %v766_v14 = vsel %vm760_vm4, %v733_v1, %v667_v54 }
  0xa7   : > { %v641_v12 = vpop.permute.xlu1 %640  ;;  %v700_v15 = vpop.permute.xlu0 %699 }
  0xa8   : > { %v799_v20 = vsel %vm793_vm5, %v766_v14, %v700_v15  ;;  %v739_v2 = vsel %vm727_vm3, %v2060_v18, %v641_v12 }
  0xa9   : > { %1698 = vmatprep.mubr.msk.bf16.mxu0 %vm849_vm6, %v799_v20 }
  0xaa   : > { %1699 = vmatmul.mubr.msk.bf16.gmra.mrb[4].mxu0 %vm849_vm6, %v801_v21 }
  0xab   : > { %v673_v22 = vpop.permute.xlu1 %672  ;;  %v639_v23 = vpop.permute.xlu0 %638 }
  0xac   : > { %v737_v26 = vsel %vm727_vm3, %v2048_v7, %v639_v23  ;;  %v772_v30 = vsel %vm760_vm4, %v739_v2, %v673_v22 }
  0xaf   : > { %v706_v3 = vpop.permute.xlu1 %705  ;;  %v671_v24 = vpop.permute.xlu0 %670 }
  0xb0   : > { %v770_v28 = vsel %vm760_vm4, %v737_v26, %v671_v24  ;;  %v805_v33 = vsel %vm793_vm5, %v772_v30, %v706_v3 }
  0xb3   : > { %v645_v25 = vpop.permute.xlu1 %644  ;;  %v704_v29 = vpop.permute.xlu0 %703 }
  0xb4   : > { %v803_v32 = vsel %vm793_vm5, %v770_v28, %v704_v29  ;;  %v743_v7 = vsel %vm727_vm3, %v2092_v39, %v645_v25 }
  0xb5   : > { %1702 = vmatprep.mubr.msk.bf16.mxu0 %vm849_vm6, %v803_v32 }
  0xb6   : > { %1703 = vmatmul.mubr.msk.bf16.gmra.mrb[8].mxu0 %vm849_vm6, %v805_v33 }
  0xb7   : > { %v677_v34 = vpop.permute.xlu1 %676  ;;  %v643_v36 = vpop.permute.xlu0 %642 }
  0xb8   : > { %v741_v40 = vsel %vm727_vm3, %v2084_v35, %v643_v36  ;;  %v776_v43 = vsel %vm760_vm4, %v743_v7, %v677_v34 }
  0xbb   : > { %v710_v18 = vpop.permute.xlu1 %709  ;;  %v675_v37 = vpop.permute.xlu0 %674 }
  0xbc   : > { %v774_v41 = vsel %vm760_vm4, %v741_v40, %v675_v37  ;;  %v809_v45 = vsel %vm793_vm5, %v776_v43, %v710_v18 }
  0xbf   : > { %v649_v38 = vpop.permute.xlu1 %648  ;;  %v708_v42 = vpop.permute.xlu0 %707 }
  0xc0   : > { %v807_v44 = vsel %vm793_vm5, %v774_v41, %v708_v42  ;;  %v747_v35 = vsel %vm727_vm3, %v2116_v52, %v649_v38 }
  0xc1   : > { %1706 = vmatprep.mubr.msk.bf16.mxu0 %vm849_vm6, %v807_v44 }
  0xc2   : > { %1707 = vmatmul.mubr.msk.bf16.gmra.mrb[12].mxu0 %vm849_vm6, %v809_v45 }
  0xc3   : > { %v681_v46 = vpop.permute.xlu1 %680  ;;  %v647_v47 = vpop.permute.xlu0 %646 }
  0xc4   : > { %v745_v51 = vsel %vm727_vm3, %v2107_v48, %v647_v47  ;;  %v780_v55 = vsel %vm760_vm4, %v747_v35, %v681_v46 }
  0xc7   : > { %v714_v39 = vpop.permute.xlu1 %713  ;;  %v679_v49 = vpop.permute.xlu0 %678 }
  0xc8   : > { %v778_v53 = vsel %vm760_vm4, %v745_v51, %v679_v49  ;;  %v813_v57 = vsel %vm793_vm5, %v780_v55, %v714_v39 }
  0xcb   : > { %v653_v50 = vpop.permute.xlu1 %652  ;;  %v712_v54 = vpop.permute.xlu0 %711 }
  0xcc   : > { %v811_v56 = vsel %vm793_vm5, %v778_v53, %v712_v54  ;;  %v751_v48 = vsel %vm727_vm3, %v2138_v0, %v653_v50 }
  0xcd   : > { %1710 = vmatprep.mubr.msk.bf16.mxu1 %vm849_vm6, %v811_v56 }
  0xce   : > { %1711 = vmatmul.mubr.msk.bf16.vlgmr.msra.gmra.mrb[0].mxu1 %vm849_vm6, %v813_v57 }
  0xcf   : > { %v685_v58 = vpop.permute.xlu1 %684  ;;  %v651_v59 = vpop.permute.xlu0 %650 }
  0xd0   : > { %v749_v62 = vsel %vm727_vm3, %v2129_v60, %v651_v59  ;;  %v784_v6 = vsel %vm760_vm4, %v751_v48, %v685_v58 }
  0xd3   : > { %v718_v52 = vpop.permute.xlu1 %717  ;;  %v683_v19 = vpop.permute.xlu0 %682 }
  0xd4   : > { %v782_v63 = vsel %vm760_vm4, %v749_v62, %v683_v19  ;;  %v817_v9 = vsel %vm793_vm5, %v784_v6, %v718_v52 }
  0xd7   : > { %v657_v61 = vpop.permute.xlu1 %656  ;;  %v716_v4 = vpop.permute.xlu0 %715 }
  0xd8   : > { %v815_v8 = vsel %vm793_vm5, %v782_v63, %v716_v4  ;;  %v755_v60 = vsel %vm727_vm3, %v2160_v17, %v657_v61 }
  0xd9   : > { %1714 = vmatprep.mubr.msk.bf16.mxu1 %vm849_vm6, %v815_v8 }
  0xda   : > { %1715 = vmatmul.mubr.msk.bf16.gmra.mrb[4].mxu1 %vm849_vm6, %v817_v9 }
  0xdb   : > { %v689_v10 = vpop.permute.xlu1 %688  ;;  %v655_v5 = vpop.permute.xlu0 %654 }
  0xdc   : > { %v753_v11 = vsel %vm727_vm3, %v2151_v13, %v655_v5  ;;  %v788_v16 = vsel %vm760_vm4, %v755_v60, %v689_v10 }
  0xdf   : > { %v722_v0 = vpop.permute.xlu1 %721  ;;  %v687_v1 = vpop.permute.xlu0 %686 }
  0xe0   : > { %v786_v14 = vsel %vm760_vm4, %v753_v11, %v687_v1  ;;  %v821_v21 = vsel %vm793_vm5, %v788_v16, %v722_v0 }
  0xe3   : > { %v661_v12 = vpop.permute.xlu1 %660  ;;  %v720_v15 = vpop.permute.xlu0 %719 }
  0xe4   : > { %v819_v20 = vsel %vm793_vm5, %v786_v14, %v720_v15  ;;  %v759_v13 = vsel %vm727_vm3, %v2182_v31, %v661_v12 }
  0xe5   : > { %1718 = vmatprep.mubr.msk.bf16.mxu1 %vm849_vm6, %v819_v20 }
  0xe6   : > { %1719 = vmatmul.mubr.msk.bf16.gmra.mrb[8].mxu1 %vm849_vm6, %v821_v21 }
  0xe7   : > { %v659_v22 = vpop.permute.xlu0 %658  ;;  %v693_v17 = vpop.permute.xlu1 %692 }
  0xe8   : > { %v757_v3 = vsel %vm727_vm3, %v2173_v27, %v659_v22  ;;  %v792_v26 = vsel %vm760_vm4, %v759_v13, %v693_v17  ;;  %v2301_v27 = vld [vmem:[%s2555_s3] ss:$0 sm:$0xff] }
  0xeb   : > { %v691_v23 = vpop.permute.xlu0 %690  ;;  %v726_v24 = vpop.permute.xlu1 %725 }
  0xec   : > { %v790_v2 = vsel %vm760_vm4, %v757_v3, %v691_v23  ;;  %v825_v29 = vsel %vm793_vm5, %v792_v26, %v726_v24 }
  0xef   : > { %v724_v25 = vpop.permute.xlu0 %723 }
  0xf0   : > { %v823_v28 = vsel %vm793_vm5, %v790_v2, %v724_v25 }
  0xf1   : > { %1722 = vmatprep.mubr.msk.bf16.mxu1 %vm849_vm6, %v823_v28 }
  0xf2   : > { %1723 = vmatmul.mubr.msk.bf16.gmra.mrb[12].mxu1 %vm849_vm6, %v825_v29 }
 0x175   : > { %v1696_v31 = vpop.f32.mrb[0].mxu0 }
 0x176   : > { %v925_v30 = vadd.f32 %v1696_v31, %v2301_v27  ;;  %v916_v32 = vpop.f32.mrb[1].mxu0 }
 0x177   : > { %v917_v33 = vadd.f32 %v2301_v27, %v916_v32  ;;  %v1697_v34 = vpop.f32.mrb[2].mxu0 }
 0x178   : > { %v1641_v36 = vpack.c.bf16 %v925_v30, %v925_v30  ;;  %v928_v18 = vadd.f32 %v1697_v34, %v2301_v27  ;;  %v919_v37 = vpop.f32.mrb[3].mxu0  ;;  %v1275_v41 = vmul.f32 %v925_v30, %v925_v30  ;;  %v1207_v49 = vsel %vm760_vm4, %v925_v30, 0.0 }
 0x179   : > { %v1639_v7 = vpack.c.bf16 %v917_v33, %v917_v33  ;;  %v1273_v38 = vmul.f32 %v917_v33, %v917_v33  ;;  %v920_v40 = vadd.f32 %v2301_v27, %v919_v37  ;;  %v1204_v43 = vsel %vm760_vm4, %v917_v33, 0.0 }
 0x17a   : > { %1174 = vst.msk [vmem:[%s2308_s6 + $0x8] sm:$0xf] %vm1171_vm7, %v1641_v36  ;;  %v1642_v42 = vpack.c.bf16 %v928_v18, %v928_v18  ;;  %v1276_v47 = vmul.f32 %v928_v18, %v928_v18  ;;  %v1308_v57 = vsel %vm760_vm4, %v1275_v41, 0.0  ;;  %v1209_v52 = vsel %vm760_vm4, %v928_v18, 0.0 }
 0x17b   : > { %1172 = vst.msk [vmem:[%s2308_s6] sm:$0xf] %vm1171_vm7, %v1639_v7  ;;  %v1640_v44 = vpack.c.bf16 %v920_v40, %v920_v40  ;;  %v1205_v45 = vsel %vm760_vm4, %v920_v40, 0.0  ;;  %v1274_v46 = vmul.f32 %v920_v40, %v920_v40  ;;  %v1305_v35 = vsel %vm760_vm4, %v1273_v38, 0.0 }
 0x17c   : > { %1175 = vst.msk [vmem:[%s2308_s6 + $0xc] sm:$0xf] %vm1171_vm7, %v1642_v42  ;;  %v1206_v39 = vadd.f32 %v1205_v45, %v1204_v43  ;;  %v1310_v19 = vsel %vm760_vm4, %v1276_v47, 0.0 }
 0x17d   : > { %1173 = vst.msk [vmem:[%s2308_s6 + $0x4] sm:$0xf] %vm1171_vm7, %v1640_v44  ;;  %v1306_v50 = vsel %vm760_vm4, %v1274_v46, 0.0  ;;  %v1700_v51 = vpop.f32.mrb[4].mxu0 }
 0x17e   : > { %v1208_v53 = vadd.f32 %v1207_v49, %v1206_v39  ;;  %v1307_v54 = vadd.f32 %v1306_v50, %v1305_v35  ;;  %v941_v55 = vadd.f32 %v1700_v51, %v2301_v27  ;;  %v932_v56 = vpop.f32.mrb[5].mxu0 }
 0x17f   : > { %v933_v58 = vadd.f32 %v2301_v27, %v932_v56  ;;  %v1701_v59 = vpop.f32.mrb[6].mxu0 }
 0x180   : > { %v1309_v48 = vadd.f32 %v1308_v57, %v1307_v54  ;;  %v1645_v61 = vpack.c.bf16 %v941_v55, %v941_v55  ;;  %v935_v62 = vpop.f32.mrb[7].mxu0  ;;  %v1210_v4 = vadd.f32 %v1209_v52, %v1208_v53  ;;  %v944_v10 = vadd.f32 %v1701_v59, %v2301_v27 }
 0x181   : > { %v1643_v63 = vpack.c.bf16 %v933_v58, %v933_v58  ;;  %v1211_v6 = vsel %vm760_vm4, %v933_v58, 0.0  ;;  %v1277_v8 = vmul.f32 %v933_v58, %v933_v58  ;;  %v936_v5 = vadd.f32 %v2301_v27, %v935_v62 }
 0x182   : > { %1178 = vst.msk [vmem:[%s2308_s6 + $0x18] sm:$0xf] %vm1171_vm7, %v1645_v61  ;;  %v1311_v9 = vadd.f32 %v1310_v19, %v1309_v48  ;;  %v1212_v0 = vadd.f32 %v1211_v6, %v1210_v4  ;;  %v1646_v11 = vpack.c.bf16 %v944_v10, %v944_v10  ;;  %v1279_v12 = vmul.f32 %v941_v55, %v941_v55 }
 0x183   : > { %1176 = vst.msk [vmem:[%s2308_s6 + $0x10] sm:$0xf] %vm1171_vm7, %v1643_v63  ;;  %v1312_v1 = vsel %vm760_vm4, %v1277_v8, 0.0  ;;  %v1644_v14 = vpack.c.bf16 %v936_v5, %v936_v5  ;;  %v1213_v15 = vsel %vm760_vm4, %v936_v5, 0.0  ;;  %v1278_v16 = vmul.f32 %v936_v5, %v936_v5 }
 0x184   : > { %v1313_v60 = vadd.f32 %v1312_v1, %v1311_v9  ;;  %1179 = vst.msk [vmem:[%s2308_s6 + $0x1c] sm:$0xf] %vm1171_vm7, %v1646_v11  ;;  %v1214_v20 = vadd.f32 %v1213_v15, %v1212_v0  ;;  %v1215_v21 = vsel %vm760_vm4, %v941_v55, 0.0  ;;  %v1280_v22 = vmul.f32 %v944_v10, %v944_v10 }
 0x185   : > { %1177 = vst.msk [vmem:[%s2308_s6 + $0x14] sm:$0xf] %vm1171_vm7, %v1644_v14  ;;  %v1314_v17 = vsel %vm760_vm4, %v1278_v16, 0.0  ;;  %v1316_v3 = vsel %vm760_vm4, %v1279_v12, 0.0  ;;  %v1217_v24 = vsel %vm760_vm4, %v944_v10, 0.0 }
 0x186   : > { %v1216_v23 = vadd.f32 %v1215_v21, %v1214_v20  ;;  %v1315_v13 = vadd.f32 %v1314_v17, %v1313_v60  ;;  %v1318_v31 = vsel %vm760_vm4, %v1280_v22, 0.0 }
 0x188   : > { %v1317_v25 = vadd.f32 %v1316_v3, %v1315_v13  ;;  %v1218_v29 = vadd.f32 %v1217_v24, %v1216_v23 }
 0x189   : > { %v1704_v2 = vpop.f32.mrb[8].mxu0 }
 0x18a   : > { %v957_v26 = vadd.f32 %v1704_v2, %v2301_v27  ;;  %v948_v28 = vpop.f32.mrb[9].mxu0  ;;  %v1319_v34 = vadd.f32 %v1318_v31, %v1317_v25 }
 0x18b   : > { %v949_v30 = vadd.f32 %v2301_v27, %v948_v28  ;;  %v1705_v32 = vpop.f32.mrb[10].mxu0 }
 0x18c   : > { %v1649_v33 = vpack.c.bf16 %v957_v26, %v957_v26  ;;  %v951_v36 = vpop.f32.mrb[11].mxu0  ;;  %v960_v38 = vadd.f32 %v1705_v32, %v2301_v27  ;;  %v1283_v42 = vmul.f32 %v957_v26, %v957_v26  ;;  %v1223_v35 = vsel %vm760_vm4, %v957_v26, 0.0 }
 0x18d   : > { %v1647_v18 = vpack.c.bf16 %v949_v30, %v949_v30  ;;  %v1219_v37 = vsel %vm760_vm4, %v949_v30, 0.0  ;;  %v1281_v7 = vmul.f32 %v949_v30, %v949_v30  ;;  %v952_v41 = vadd.f32 %v2301_v27, %v951_v36 }
 0x18e   : > { %1182 = vst.msk [vmem:[%s2308_s6 + $0x28] sm:$0xf] %vm1171_vm7, %v1649_v33  ;;  %v1220_v40 = vadd.f32 %v1219_v37, %v1218_v29  ;;  %v1650_v44 = vpack.c.bf16 %v960_v38, %v960_v38  ;;  %v1284_v50 = vmul.f32 %v960_v38, %v960_v38  ;;  %v1324_v55 = vsel %vm760_vm4, %v1283_v42, 0.0 }
 0x18f   : > { %1180 = vst.msk [vmem:[%s2308_s6 + $0x20] sm:$0xf] %vm1171_vm7, %v1647_v18  ;;  %v1320_v43 = vsel %vm760_vm4, %v1281_v7, 0.0  ;;  %v1648_v46 = vpack.c.bf16 %v952_v41, %v952_v41  ;;  %v1221_v47 = vsel %vm760_vm4, %v952_v41, 0.0  ;;  %v1282_v39 = vmul.f32 %v952_v41, %v952_v41 }
 0x190   : > { %v1321_v45 = vadd.f32 %v1320_v43, %v1319_v34  ;;  %1183 = vst.msk [vmem:[%s2308_s6 + $0x2c] sm:$0xf] %vm1171_vm7, %v1650_v44  ;;  %v1222_v49 = vadd.f32 %v1221_v47, %v1220_v40  ;;  %v1225_v56 = vsel %vm760_vm4, %v960_v38, 0.0  ;;  %v1326_v52 = vsel %vm760_vm4, %v1284_v50, 0.0 }
 0x191   : > { %1181 = vst.msk [vmem:[%s2308_s6 + $0x24] sm:$0xf] %vm1171_vm7, %v1648_v46  ;;  %v1322_v51 = vsel %vm760_vm4, %v1282_v39, 0.0 }
 0x192   : > { %v1224_v53 = vadd.f32 %v1223_v35, %v1222_v49  ;;  %v1323_v54 = vadd.f32 %v1322_v51, %v1321_v45 }
 0x194   : > { %v1325_v57 = vadd.f32 %v1324_v55, %v1323_v54  ;;  %v1226_v59 = vadd.f32 %v1225_v56, %v1224_v53 }
 0x195   : > { %v1708_v58 = vpop.f32.mrb[12].mxu0 }
 0x196   : > { %v973_v19 = vadd.f32 %v1708_v58, %v2301_v27  ;;  %v964_v48 = vpop.f32.mrb[13].mxu0  ;;  %v1327_v62 = vadd.f32 %v1326_v52, %v1325_v57 }
 0x197   : > { %v965_v61 = vadd.f32 %v2301_v27, %v964_v48  ;;  %v1709_v63 = vpop.f32.mrb[14].mxu0 }
 0x198   : > { %v1653_v4 = vpack.c.bf16 %v973_v19, %v973_v19  ;;  %v976_v6 = vadd.f32 %v1709_v63, %v2301_v27  ;;  %v967_v8 = vpop.f32.mrb[15].mxu0  ;;  %v1287_v15 = vmul.f32 %v973_v19, %v973_v19  ;;  %v1231_v22 = vsel %vm760_vm4, %v973_v19, 0.0 }
 0x199   : > { %v1651_v9 = vpack.c.bf16 %v965_v61, %v965_v61  ;;  %v1227_v10 = vsel %vm760_vm4, %v965_v61, 0.0  ;;  %v1285_v5 = vmul.f32 %v965_v61, %v965_v61  ;;  %v968_v0 = vadd.f32 %v2301_v27, %v967_v8 }
 0x19a   : > { %1186 = vst.msk [vmem:[%s2308_s6 + $0x38] sm:$0xf] %vm1171_vm7, %v1653_v4  ;;  %v1228_v1 = vadd.f32 %v1227_v10, %v1226_v59  ;;  %v1654_v60 = vpack.c.bf16 %v976_v6, %v976_v6  ;;  %v1288_v17 = vmul.f32 %v976_v6, %v976_v6  ;;  %v1233_v3 = vsel %vm760_vm4, %v976_v6, 0.0 }
 0x19b   : > { %1184 = vst.msk [vmem:[%s2308_s6 + $0x30] sm:$0xf] %vm1171_vm7, %v1651_v9  ;;  %v1328_v11 = vsel %vm760_vm4, %v1285_v5, 0.0  ;;  %v1652_v12 = vpack.c.bf16 %v968_v0, %v968_v0  ;;  %v1229_v14 = vsel %vm760_vm4, %v968_v0, 0.0  ;;  %v1286_v21 = vmul.f32 %v968_v0, %v968_v0 }
 0x19c   : > { %v1329_v16 = vadd.f32 %v1328_v11, %v1327_v62  ;;  %1187 = vst.msk [vmem:[%s2308_s6 + $0x3c] sm:$0xf] %vm1171_vm7, %v1654_v60  ;;  %v1230_v20 = vadd.f32 %v1229_v14, %v1228_v1  ;;  %v1332_v2 = vsel %vm760_vm4, %v1287_v15, 0.0  ;;  %v1334_v29 = vsel %vm760_vm4, %v1288_v17, 0.0 }
 0x19d   : > { %1185 = vst.msk [vmem:[%s2308_s6 + $0x34] sm:$0xf] %vm1171_vm7, %v1652_v12  ;;  %v1330_v13 = vsel %vm760_vm4, %v1286_v21, 0.0 }
 0x19e   : > { %v1232_v23 = vadd.f32 %v1231_v22, %v1230_v20  ;;  %v1331_v24 = vadd.f32 %v1330_v13, %v1329_v16 }
 0x1a0   : > { %v1234_v25 = vadd.f32 %v1233_v3, %v1232_v23  ;;  %v1333_v26 = vadd.f32 %v1332_v2, %v1331_v24 }
 0x1a1   : > { %v1712_v28 = vpop.f32.mrb[0].mxu1 }
 0x1a2   : > { %v989_v31 = vadd.f32 %v1712_v28, %v2301_v27  ;;  %v980_v30 = vpop.f32.mrb[1].mxu1  ;;  %v1335_v33 = vadd.f32 %v1334_v29, %v1333_v26 }
 0x1a3   : > { %v981_v32 = vadd.f32 %v2301_v27, %v980_v30  ;;  %v1713_v34 = vpop.f32.mrb[2].mxu1 }
 0x1a4   : > { %v1657_v36 = vpack.c.bf16 %v989_v31, %v989_v31  ;;  %v992_v18 = vadd.f32 %v1713_v34, %v2301_v27  ;;  %v983_v37 = vpop.f32.mrb[3].mxu1  ;;  %v1291_v47 = vmul.f32 %v989_v31, %v989_v31  ;;  %v1239_v50 = vsel %vm760_vm4, %v989_v31, 0.0 }
 0x1a5   : > { %v1655_v7 = vpack.c.bf16 %v981_v32, %v981_v32  ;;  %v1235_v38 = vsel %vm760_vm4, %v981_v32, 0.0  ;;  %v1289_v40 = vmul.f32 %v981_v32, %v981_v32  ;;  %v984_v41 = vadd.f32 %v2301_v27, %v983_v37 }
 0x1a6   : > { %1190 = vst.msk [vmem:[%s2308_s6 + $0x48] sm:$0xf] %vm1171_vm7, %v1657_v36  ;;  %v1236_v42 = vadd.f32 %v1235_v38, %v1234_v25  ;;  %v1658_v43 = vpack.c.bf16 %v992_v18, %v992_v18  ;;  %v1292_v51 = vmul.f32 %v992_v18, %v992_v18  ;;  %v1241_v55 = vsel %vm760_vm4, %v992_v18, 0.0 }
 0x1a7   : > { %1188 = vst.msk [vmem:[%s2308_s6 + $0x40] sm:$0xf] %vm1171_vm7, %v1655_v7  ;;  %v1336_v44 = vsel %vm760_vm4, %v1289_v40, 0.0  ;;  %v1656_v45 = vpack.c.bf16 %v984_v41, %v984_v41  ;;  %v1237_v46 = vsel %vm760_vm4, %v984_v41, 0.0  ;;  %v1290_v35 = vmul.f32 %v984_v41, %v984_v41 }
 0x1a8   : > { %v1337_v39 = vadd.f32 %v1336_v44, %v1335_v33  ;;  %1191 = vst.msk [vmem:[%s2308_s6 + $0x4c] sm:$0xf] %vm1171_vm7, %v1658_v43  ;;  %v1238_v49 = vadd.f32 %v1237_v46, %v1236_v42  ;;  %v1340_v57 = vsel %vm760_vm4, %v1291_v47, 0.0  ;;  %v1342_v19 = vsel %vm760_vm4, %v1292_v51, 0.0 }
 0x1a9   : > { %1189 = vst.msk [vmem:[%s2308_s6 + $0x44] sm:$0xf] %vm1171_vm7, %v1656_v45  ;;  %v1338_v54 = vsel %vm760_vm4, %v1290_v35, 0.0 }
 0x1aa   : > { %v1240_v53 = vadd.f32 %v1239_v50, %v1238_v49  ;;  %v1339_v56 = vadd.f32 %v1338_v54, %v1337_v39 }
 0x1ac   : > { %v1242_v58 = vadd.f32 %v1241_v55, %v1240_v53  ;;  %v1341_v59 = vadd.f32 %v1340_v57, %v1339_v56 }
 0x1ad   : > { %v1716_v52 = vpop.f32.mrb[4].mxu1 }
 0x1ae   : > { %v1005_v48 = vadd.f32 %v1716_v52, %v2301_v27  ;;  %v996_v61 = vpop.f32.mrb[5].mxu1  ;;  %v1343_v63 = vadd.f32 %v1342_v19, %v1341_v59 }
 0x1af   : > { %v997_v62 = vadd.f32 %v2301_v27, %v996_v61  ;;  %v1717_v4 = vpop.f32.mrb[6].mxu1 }
 0x1b0   : > { %v1661_v6 = vpack.c.bf16 %v1005_v48, %v1005_v48  ;;  %v1008_v8 = vadd.f32 %v1717_v4, %v2301_v27  ;;  %v999_v9 = vpop.f32.mrb[7].mxu1  ;;  %v1295_v16 = vmul.f32 %v1005_v48, %v1005_v48  ;;  %v1247_v17 = vsel %vm760_vm4, %v1005_v48, 0.0 }
 0x1b1   : > { %v1659_v10 = vpack.c.bf16 %v997_v62, %v997_v62  ;;  %v1243_v5 = vsel %vm760_vm4, %v997_v62, 0.0  ;;  %v1293_v0 = vmul.f32 %v997_v62, %v997_v62  ;;  %v1000_v1 = vadd.f32 %v2301_v27, %v999_v9 }
 0x1b2   : > { %1194 = vst.msk [vmem:[%s2308_s6 + $0x58] sm:$0xf] %vm1171_vm7, %v1661_v6  ;;  %v1244_v60 = vadd.f32 %v1243_v5, %v1242_v58  ;;  %v1662_v11 = vpack.c.bf16 %v1008_v8, %v1008_v8  ;;  %v1296_v23 = vmul.f32 %v1008_v8, %v1008_v8  ;;  %v1249_v24 = vsel %vm760_vm4, %v1008_v8, 0.0 }
 0x1b3   : > { %1192 = vst.msk [vmem:[%s2308_s6 + $0x50] sm:$0xf] %vm1171_vm7, %v1659_v10  ;;  %v1344_v12 = vsel %vm760_vm4, %v1293_v0, 0.0  ;;  %v1660_v14 = vpack.c.bf16 %v1000_v1, %v1000_v1  ;;  %v1245_v15 = vsel %vm760_vm4, %v1000_v1, 0.0  ;;  %v1294_v22 = vmul.f32 %v1000_v1, %v1000_v1 }
 0x1b4   : > { %v1345_v20 = vadd.f32 %v1344_v12, %v1343_v63  ;;  %1195 = vst.msk [vmem:[%s2308_s6 + $0x5c] sm:$0xf] %vm1171_vm7, %v1662_v11  ;;  %v1246_v21 = vadd.f32 %v1245_v15, %v1244_v60  ;;  %v1348_v25 = vsel %vm760_vm4, %v1295_v16, 0.0  ;;  %v1350_v31 = vsel %vm760_vm4, %v1296_v23, 0.0 }
 0x1b5   : > { %1193 = vst.msk [vmem:[%s2308_s6 + $0x54] sm:$0xf] %vm1171_vm7, %v1660_v14  ;;  %v1346_v3 = vsel %vm760_vm4, %v1294_v22, 0.0 }
 0x1b6   : > { %v1248_v13 = vadd.f32 %v1247_v17, %v1246_v21  ;;  %v1347_v2 = vadd.f32 %v1346_v3, %v1345_v20 }
 0x1b8   : > { %v1250_v26 = vadd.f32 %v1249_v24, %v1248_v13  ;;  %v1349_v28 = vadd.f32 %v1348_v25, %v1347_v2 }
 0x1b9   : > { %v1720_v29 = vpop.f32.mrb[8].mxu1 }
 0x1ba   : > { %v1021_v30 = vadd.f32 %v1720_v29, %v2301_v27  ;;  %v1012_v32 = vpop.f32.mrb[9].mxu1  ;;  %v1351_v34 = vadd.f32 %v1350_v31, %v1349_v28 }
 0x1bb   : > { %v1013_v33 = vadd.f32 %v2301_v27, %v1012_v32  ;;  %v1721_v36 = vpop.f32.mrb[10].mxu1 }
 0x1bc   : > { %v1665_v18 = vpack.c.bf16 %v1021_v30, %v1021_v30  ;;  %v1024_v37 = vadd.f32 %v1721_v36, %v2301_v27  ;;  %v1015_v7 = vpop.f32.mrb[11].mxu1  ;;  %v1299_v39 = vmul.f32 %v1021_v30, %v1021_v30  ;;  %v1255_v51 = vsel %vm760_vm4, %v1021_v30, 0.0 }
 0x1bd   : > { %v1663_v38 = vpack.c.bf16 %v1013_v33, %v1013_v33  ;;  %v1251_v40 = vsel %vm760_vm4, %v1013_v33, 0.0  ;;  %v1297_v41 = vmul.f32 %v1013_v33, %v1013_v33  ;;  %v1016_v42 = vadd.f32 %v2301_v27, %v1015_v7 }
 0x1be   : > { %1198 = vst.msk [vmem:[%s2308_s6 + $0x68] sm:$0xf] %vm1171_vm7, %v1665_v18  ;;  %v1252_v43 = vadd.f32 %v1251_v40, %v1250_v26  ;;  %v1666_v44 = vpack.c.bf16 %v1024_v37, %v1024_v37  ;;  %v1300_v53 = vmul.f32 %v1024_v37, %v1024_v37  ;;  %v1257_v56 = vsel %vm760_vm4, %v1024_v37, 0.0 }
 0x1bf   : > { %1196 = vst.msk [vmem:[%s2308_s6 + $0x60] sm:$0xf] %vm1171_vm7, %v1663_v38  ;;  %v1352_v45 = vsel %vm760_vm4, %v1297_v41, 0.0  ;;  %v1664_v46 = vpack.c.bf16 %v1016_v42, %v1016_v42  ;;  %v1253_v47 = vsel %vm760_vm4, %v1016_v42, 0.0  ;;  %v1298_v50 = vmul.f32 %v1016_v42, %v1016_v42 }
 0x1c0   : > { %v1353_v49 = vadd.f32 %v1352_v45, %v1351_v34  ;;  %1199 = vst.msk [vmem:[%s2308_s6 + $0x6c] sm:$0xf] %vm1171_vm7, %v1666_v44  ;;  %v1254_v35 = vadd.f32 %v1253_v47, %v1252_v43  ;;  %v1356_v58 = vsel %vm760_vm4, %v1299_v39, 0.0  ;;  %v1358_v48 = vsel %vm760_vm4, %v1300_v53, 0.0 }
 0x1c1   : > { %1197 = vst.msk [vmem:[%s2308_s6 + $0x64] sm:$0xf] %vm1171_vm7, %v1664_v46  ;;  %v1354_v55 = vsel %vm760_vm4, %v1298_v50, 0.0 }
 0x1c2   : > { %v1256_v54 = vadd.f32 %v1255_v51, %v1254_v35  ;;  %v1355_v57 = vadd.f32 %v1354_v55, %v1353_v49 }
 0x1c4   : > { %v1258_v59 = vadd.f32 %v1257_v56, %v1256_v54  ;;  %v1357_v52 = vadd.f32 %v1356_v58, %v1355_v57 }
 0x1c5   : > { %v1724_v19 = vpop.f32.mrb[12].mxu1 }
 0x1c6   : > { %v1037_v61 = vadd.f32 %v1724_v19, %v2301_v27  ;;  %v1028_v62 = vpop.f32.mrb[13].mxu1  ;;  %v1359_v4 = vadd.f32 %v1358_v48, %v1357_v52 }
 0x1c7   : > { %v1029_v63 = vadd.f32 %v2301_v27, %v1028_v62  ;;  %v1725_v6 = vpop.f32.mrb[14].mxu1 }
 0x1c8   : > { %v1669_v8 = vpack.c.bf16 %v1037_v61, %v1037_v61  ;;  %v1040_v9 = vadd.f32 %v1725_v6, %v2301_v27  ;;  %v1031_v10 = vpop.f32.mrb[15].mxu1  ;;  %v1303_v16 = vmul.f32 %v1037_v61, %v1037_v61  ;;  %v1263_v17 = vsel %vm760_vm4, %v1037_v61, 0.0 }
 0x1c9   : > { %v1667_v5 = vpack.c.bf16 %v1029_v63, %v1029_v63  ;;  %v1259_v0 = vsel %vm760_vm4, %v1029_v63, 0.0  ;;  %v1301_v1 = vmul.f32 %v1029_v63, %v1029_v63  ;;  %v1032_v60 = vadd.f32 %v2301_v27, %v1031_v10 }
 0x1ca   : > { %1202 = vst.msk [vmem:[%s2308_s6 + $0x78] sm:$0xf] %vm1171_vm7, %v1669_v8  ;;  %v1260_v11 = vadd.f32 %v1259_v0, %v1258_v59  ;;  %v1670_v12 = vpack.c.bf16 %v1040_v9, %v1040_v9  ;;  %v1304_v23 = vmul.f32 %v1040_v9, %v1040_v9 }
 0x1cb   : > { %1200 = vst.msk [vmem:[%s2308_s6 + $0x70] sm:$0xf] %vm1171_vm7, %v1667_v5  ;;  %v1360_v14 = vsel %vm760_vm4, %v1301_v1, 0.0  ;;  %v1668_v27 = vpack.c.bf16 %v1032_v60, %v1032_v60  ;;  %v1261_v15 = vsel %vm760_vm4, %v1032_v60, 0.0  ;;  %v1302_v22 = vmul.f32 %v1032_v60, %v1032_v60 }
 0x1cc   : > { %v1361_v20 = vadd.f32 %v1360_v14, %v1359_v4  ;;  %1203 = vst.msk [vmem:[%s2308_s6 + $0x7c] sm:$0xf] %vm1171_vm7, %v1670_v12  ;;  %v1262_v21 = vadd.f32 %v1261_v15, %v1260_v11 }
 0x1cd   : > { %1201 = vst.msk [vmem:[%s2308_s6 + $0x74] sm:$0xf] %vm1171_vm7, %v1668_v27  ;;  %v1362_v3 = vsel %vm760_vm4, %v1302_v22, 0.0 }
 0x1ce   : > { %v1264_v13 = vadd.f32 %v1263_v17, %v1262_v21 }
 0x1cf   : > { %1827 = shalt.err (!%p1824_p5)
}
 0x1d0   : > { %s1828_s17 = scalar_lea.hbm %s2458_s11, 2048  ;;  %s1832_s28 = scalar_lea.hbm %s2556_s4, 4096 }
 0x1d1   : > { %p1829_p6 = scmp.ne.s32.totalorder %s2458_s11, %s1828_s17  ;;  %p1833_p10 = scmp.lt.u32.totalorder %s2458_s11, %s2556_s4 }
 0x1d2   : > { %p1834_p11 = scmp.lt.u32.totalorder %s1832_s28, %s1828_s17  ;;  %p1836_p13 = scmp.lt.u32.totalorder %s1828_s17, %s2458_s11 }
 0x1d3   : > { %p1830_p7 = pnand %p1829_p6, %p2004_p4 }
 0x1d4   : > { %p1835_p12 = por %p1834_p11, %p1833_p10 }
 0x1d5   : > { %p1831_p9 = pneg %p1830_p7 }
 0x1d6   : > { %p1837_p0 = por %p1836_p13, %p1835_p12 }
 0x1d8   : > { %p1838_p1 = pnand %p1837_p0, %p1831_p9 }
 0x1da   : > { %1841 = shalt.err (!%p1838_p1)
}
 0x1db   : > { %s1931_s9 = smov 64   ;;  %s1932_s10 = smov 4   ;;  %v1265_v24 = vsel %vm760_vm4, %v1040_v9, 0.0  ;;  %v1363_v2 = vadd.f32 %v1362_v3, %v1361_v20  ;;  %v1364_v25 = vsel %vm760_vm4, %v1303_v16, 0.0  ;;  %v1366_v29 = vsel %vm760_vm4, %v1304_v23, 0.0 }
 0x1dc   : > { %1730 = dma.vmem_to_hbm [thread:$0]  (%p2004_p4), %s2460_s8, 2048, %s2458_s11, %s1379_s12, %s1931_s9, %s1931_s9, %s1932_s10   ;;  %v1266_v26 = vadd.f32 %v1265_v24, %v1264_v13  ;;  %vm1374_vm8 = vcmask 1040384   ;;  %vm1376_vm9 = vcmask 123904  }
 0x1dd   : > { %v1365_v28 = vadd.f32 %v1364_v25, %v1363_v2  ;;  %s1556_s13 = sshll.u32 %s2296_s23, 1  ;;  %s1633_s8 = sshll.u32 %s1916_s20, 5 }
 0x1de   : > { %v1267_v31 = vrot.slane %v1266_v26, 4  ;;  %s302_s11 = scalar_lea.vmem [#allocation4], %s1556_s13  ;;  %s2504_s16 = scalar_lea.hbm %s2557_s5, %s1633_s8 }
 0x1df   : > { %v1367_v30 = vadd.f32 %v1366_v29, %v1365_v28  ;;  %s1417_s12 = sshll.u32 %s302_s11, 4  ;;  %s1384_s17 = scalar_lea.sflag [#allocation5], %s2296_s23  ;;  %s2506_s12 = int_to_ptr.vmem [resolvable:$true] %s1417_s12 }
 0x1e0   : > { %v1268_v32 = vadd.f32 %v1267_v31, %v1266_v26  ;;  %s1842_s20 = scalar_lea.vmem %s2506_s12, 32  ;;  %s1933_s24 = smov [#allocation4]  }
 0x1e1   : > { %v1368_v33 = vrot.slane %v1367_v30, 4  ;;  %p1843_p2 = scmp.ne.s32.totalorder %s2506_s12, %s1842_s20  ;;  %s1846_s26 = sshll.u32 %s1933_s24, 4  ;;  %s1847_s26 = int_to_ptr.vmem [resolvable:$false] %s1846_s26 }
 0x1e2   : > { %v1269_v34 = vrot.slane %v1268_v32, 2  ;;  %s1848_s28 = scalar_lea.vmem %s1847_s26, 64  ;;  %p1849_p6 = scmp.lt.s32.totalorder %s2506_s12, %s1847_s26 }
 0x1e3   : > { %v1369_v36 = vadd.f32 %v1368_v33, %v1367_v30  ;;  %p1844_p3 = pnand %p1843_p2, %p2004_p4  ;;  %p1850_p7 = scmp.lt.s32.totalorder %s1848_s28, %s1842_s20 }
 0x1e4   : > { %v1270_v18 = vadd.f32 %v1269_v34, %v1268_v32 }
 0x1e5   : > { %v1370_v37 = vrot.slane %v1369_v36, 2  ;;  %p1845_p5 = pneg %p1844_p3  ;;  %p1851_p9 = por %p1850_p7, %p1849_p6 }
 0x1e6   : > { %v1271_v7 = vrot.slane %v1270_v18, 1 }
 0x1e7   : > { %v1371_v38 = vadd.f32 %v1370_v37, %v1369_v36  ;;  %p1852_p10 = pnand %p1851_p9, %p1845_p5 }
 0x1e8   : > { %v1272_v41 = vadd.f32 %v1271_v7, %v1270_v18 }
 0x1e9   : > { %v1372_v40 = vrot.slane %v1371_v38, 1 }
 0x1eb   : > { %v1373_v42 = vadd.f32 %v1372_v40, %v1371_v38 }
 0x1ed   : > { %v1375_v43 = vsel %vm1374_vm8, %v1272_v41, %v1373_v42 }
 0x1ee   : > { %1377 = vst.msk [vmem:[%s302_s11] sm:$0x3] %vm1376_vm9, %v1375_v43 }
 0x1ef   : > { %1855 = shalt.err (!%p1852_p10)
}
 0x1f0   : > { %s1856_s23 = scalar_lea.hbm %s2504_s16, 32  ;;  %s1860_s9 = scalar_lea.hbm %s2557_s5, 64 }
 0x1f1   : > { %p1857_p11 = scmp.ne.s32.totalorder %s2504_s16, %s1856_s23  ;;  %p1861_p0 = scmp.lt.u32.totalorder %s2504_s16, %s2557_s5 }
 0x1f2   : > { %p1862_p1 = scmp.lt.u32.totalorder %s1860_s9, %s1856_s23  ;;  %p1864_p3 = scmp.lt.u32.totalorder %s1856_s23, %s2504_s16 }
 0x1f3   : > { %p1858_p12 = pnand %p1857_p11, %p2004_p4 }
 0x1f4   : > { %p1863_p2 = por %p1862_p1, %p1861_p0 }
 0x1f5   : > { %p1859_p13 = pneg %p1858_p12 }
 0x1f6   : > { %p1865_p5 = por %p1864_p3, %p1863_p2 }
 0x1f8   : > { %p1866_p6 = pnand %p1865_p5, %p1859_p13 }
 0x1fa   : > { %1869 = shalt.err (!%p1866_p6)
}
 0x1fb   : > { %1731 = dma.vmem_to_hbm [thread:$0]  (%p2004_p4), %s2506_s12, 32, %s2504_s16, %s1384_s17  }
 0x1fc PF: > { %p1741_p7 = scmp.ge.s32.totalorder %s1924_s22, 2  ;;  %s1429_s8 = sand.u32 1, %s1904_s18  }
 0x1fd   : > { %s1430_s11 = scalar_lea.sflag [#allocation3], %s1429_s8 }
 0x1fe   : > { %p1735_p9 = pnand %p1741_p7, %p2011_p8 }
 0x200   : > { %1895 = dma.done.wait (!%p1735_p9), %s1430_s11, 2048  }
 0x201   : > { %1897 = vsyncadd (!%p1735_p9), %s1430_s11, 4294965248  ;;  %s1439_s14 = scalar_lea.sflag [#allocation5], %s1429_s8 }
 0x202   : > { %1899 = dma.done.wait (!%p1735_p9), %s1439_s14, 32  }
 0x203   : > { %1901 = vsyncadd (!%p1735_p9), %s1439_s14, 4294967264  ;;  %s22_s22 = sadd.s32 1, %s1924_s22   ;;  %s2562_s18 = smov %s1908_s19 }
 0x204   : > { %p19_p10 = scmp.ge.s32.totalorder %s22_s22, 4   ;;  %s2563_s19 = smov %s1912_s1 }
 0x205   : > { %s2564_s1 = smov %s2017_s30  ;;  %s2565_s20 = smov %s1920_s21 }
 0x206   : > { %s2566_s21 = smov %s2568_s25  ;;  %21 = sbr.rel (!%p19_p10) target bundleno = 6 (0x6), region = 91 }
 0x20d   :  { %1444 = vsyncpa [#allocation3], 1 }
 0x20e   :  { %1446 = vsyncpa [#allocation3 + $0x1], 1 }
 0x20f   :  { %1447 = vsyncpa [#allocation5], 1 }
 0x210   :  { %1449 = vsyncpa [#allocation5 + $0x1], 1 }

</bundles_post_ra>
